<compile_context>
chip_gen: v5e
topology: v5e:2x2
jax: 0.10.0
libtpu: 0.0.40
codegen_flags: <defaults>
</compile_context>

<pallas_src>
import functools

import jax
import jax.numpy as jnp
from jax.experimental import pallas as pl
from jax.experimental.pallas import tpu as pltpu

_LANE = 128
_NEG_INF = -1e30


def _fused_kernel(x_ref, mem_t_ref, mem_r_ref, w_ref, bm_ref, out_ref, *,
                  in_dim, hidden, m_pad):
    f32, bf16 = jnp.float32, jnp.bfloat16
    H = hidden

    # Bias / mask slab (f32), lane-tile aligned segments:
    #   [0 : m_pad)                      additive softmax mask (0 valid, -1e30 pad)
    #   [m_pad + k*128 : ...) k=0..3     b_enc, b_tr, b_ct, b1 (first H lanes)
    #   [m_pad + 4*128 : m_pad + 5*128)  b2 (out_dim zero-padded to 128 lanes)
    mask  = bm_ref[:, 0:m_pad]
    b_enc = bm_ref[:, m_pad + 0 * _LANE: m_pad + 0 * _LANE + H]
    b_tr  = bm_ref[:, m_pad + 1 * _LANE: m_pad + 1 * _LANE + H]
    b_ct  = bm_ref[:, m_pad + 2 * _LANE: m_pad + 2 * _LANE + H]
    b1    = bm_ref[:, m_pad + 3 * _LANE: m_pad + 3 * _LANE + H]
    b2    = bm_ref[:, m_pad + 4 * _LANE: m_pad + 5 * _LANE]

    # Weight slab (bf16, [5*H, 128]); block k occupies rows [k*H, (k+1)*H).
    w_enc = w_ref[0:in_dim, 0:H]            # only the first in_dim rows are real
    w_tr  = w_ref[1 * H:2 * H, 0:H]
    w_ct  = w_ref[2 * H:3 * H, 0:H]
    w1    = w_ref[3 * H:4 * H, 0:H]
    w2    = w_ref[4 * H:5 * H, :]           # out_dim zero-padded to 128 lanes

    # --- MemoryNetwork: encode ------------------------------------------------
    x = x_ref[...]                                               # [B, in_dim] bf16
    h = jnp.dot(x, w_enc, preferred_element_type=f32) + b_enc
    h = jnp.maximum(h, 0.0)                                      # [B, H] f32

    # --- MemoryNetwork: softmax attention read over the memory bank ------------
    scores = jnp.dot(h.astype(bf16), mem_t_ref[...],
                     preferred_element_type=f32) + mask          # [B, M_pad] f32
    scores = scores - jnp.max(scores, axis=-1, keepdims=True)
    p = jnp.exp(scores)                                          # pad cols -> 0
    inv = pl.reciprocal(jnp.sum(p, axis=-1, keepdims=True), approx=True)  # EUP
    read = jnp.dot(p.astype(bf16), mem_r_ref[...],
                   preferred_element_type=f32)                   # [B, H] f32
    memory_features = h + read * inv                             # normalize post-matmul

    # --- TransferLearner --------------------------------------------------------
    tr = jnp.maximum(jnp.dot(memory_features.astype(bf16), w_tr,
                             preferred_element_type=f32) + b_tr, 0.0)

    # --- ContinualLearner (residual) --------------------------------------------
    ct = jnp.dot(tr.astype(bf16), w_ct, preferred_element_type=f32) + b_ct
    enhanced = tr + jnp.maximum(ct, 0.0)

    # --- Head: Linear -> ReLU -> Dropout(0.2, eval=identity) -> Linear ----------
    z = jnp.maximum(jnp.dot(enhanced.astype(bf16), w1,
                            preferred_element_type=f32) + b1, 0.0)
    out = jnp.dot(z.astype(bf16), w2, preferred_element_type=f32) + b2   # [B, 128]
    out_ref[...] = out.astype(out_ref.dtype)


def memory_enhanced_model(x, packed):
    """Single fused, grid-less pallas_call; everything fits VMEM at these shapes."""
    meta = packed["meta"]
    in_dim, hidden, out_dim, m_pad = (meta["in_dim"], meta["hidden"],
                                      meta["out_dim"], meta["m_pad"])
    B = x.shape[0]

    args = (x.astype(jnp.bfloat16), packed["mem_t"], packed["mem_read"],
            packed["w_slab"], packed["bias_mask"])

    flops = 2 * B * (in_dim * hidden            # encode
                     + 2 * hidden * m_pad       # scores + read
                     + 3 * hidden * hidden      # transfer, continual, head-1
                     + hidden * _LANE)          # head-2 (lane-padded)
    bytes_accessed = (sum(int(a.size) * a.dtype.itemsize for a in args)
                      + B * _LANE * 4)

    kernel = functools.partial(_fused_kernel, in_dim=in_dim, hidden=hidden,
                               m_pad=m_pad)
    vmem = lambda: pl.BlockSpec(memory_space=pltpu.MemorySpace.VMEM)

    out = pl.pallas_call(
        kernel,
        out_shape=jax.ShapeDtypeStruct((B, _LANE), jnp.float32),
        in_specs=[vmem() for _ in args],
        out_specs=vmem(),
        cost_estimate=pl.CostEstimate(flops=flops,
                                      transcendentals=B * (m_pad + 1),
                                      bytes_accessed=bytes_accessed),
    )(*args)
    return out[:, :out_dim]                     # lane-dense writeback, host slice


def init_params(key, input_dim, hidden_dim, output_dim, memory_size=1000):
    """Logical (unpacked) parameters; weights / memory stored bf16, biases f32."""
    ks = jax.random.split(key, 6)
    bf16 = jnp.bfloat16

    def lin(k, fan_in, fan_out):
        bound = float(fan_in) ** -0.5
        kw, kb = jax.random.split(k)
        w = jax.random.uniform(kw, (fan_in, fan_out), jnp.float32, -bound, bound)
        b = jax.random.uniform(kb, (1, fan_out), jnp.float32, -bound, bound)
        return w.astype(bf16), b                 # bf16 MXU operand, f32 bias

    w_enc, b_enc = lin(ks[0], input_dim, hidden_dim)
    w_tr, b_tr = lin(ks[2], hidden_dim, hidden_dim)
    w_ct, b_ct = lin(ks[3], hidden_dim, hidden_dim)
    w1, b1 = lin(ks[4], hidden_dim, hidden_dim)
    w2, b2 = lin(ks[5], hidden_dim, output_dim)
    mem = (jax.random.normal(ks[1], (memory_size, hidden_dim), jnp.float32)
           * 0.1).astype(bf16)                    # [M, H]

    return {"w_enc": w_enc, "b_enc": b_enc, "w_tr": w_tr, "b_tr": b_tr,
            "w_ct": w_ct, "b_ct": b_ct, "w1": w1, "b1": b1,
            "w2": w2, "b2": b2, "memory": mem,
            "dims": (input_dim, hidden_dim, output_dim, memory_size)}


def pack_params(p):
    """Pack logical params into the 4 kernel-side slabs (done once, off the hot path)."""
    bf16, f32 = jnp.bfloat16, jnp.float32
    in_dim, hidden, out_dim, memory_size = p["dims"]
    m_pad = ((memory_size + _LANE - 1) // _LANE) * _LANE

    # Memory bank, zero-padded to a lane multiple, in both matmul layouts.
    mem = p["memory"].astype(f32)                                  # [M, H]
    mem_pad = jnp.zeros((m_pad, hidden), f32).at[:memory_size].set(mem)
    mem_read = mem_pad.astype(bf16)                                # [M_pad, H]
    mem_t = mem_pad.T.astype(bf16)                                 # [H, M_pad]

    # Weight slab: 5 blocks of H rows, 128 lanes (unused entries zero).
    w_slab = jnp.zeros((5 * hidden, _LANE), f32)
    w_slab = w_slab.at[0:in_dim, 0:hidden].set(p["w_enc"].astype(f32))
    w_slab = w_slab.at[1 * hidden:2 * hidden, 0:hidden].set(p["w_tr"].astype(f32))
    w_slab = w_slab.at[2 * hidden:3 * hidden, 0:hidden].set(p["w_ct"].astype(f32))
    w_slab = w_slab.at[3 * hidden:4 * hidden, 0:hidden].set(p["w1"].astype(f32))
    w_slab = w_slab.at[4 * hidden:5 * hidden, 0:out_dim].set(p["w2"].astype(f32))
    w_slab = w_slab.astype(bf16)

    # Bias + additive softmax-mask slab.  Mask is required for correctness:
    # pad-column raw scores are 0 and could otherwise dominate all-negative rows.
    bm = jnp.zeros((1, m_pad + 5 * _LANE), f32)
    mask = jnp.where(jnp.arange(m_pad) < memory_size, 0.0, _NEG_INF)
    bm = bm.at[0, 0:m_pad].set(mask)
    bm = bm.at[0, m_pad + 0 * _LANE: m_pad + 0 * _LANE + hidden].set(p["b_enc"][0])
    bm = bm.at[0, m_pad + 1 * _LANE: m_pad + 1 * _LANE + hidden].set(p["b_tr"][0])
    bm = bm.at[0, m_pad + 2 * _LANE: m_pad + 2 * _LANE + hidden].set(p["b_ct"][0])
    bm = bm.at[0, m_pad + 3 * _LANE: m_pad + 3 * _LANE + hidden].set(p["b1"][0])
    bm = bm.at[0, m_pad + 4 * _LANE: m_pad + 4 * _LANE + out_dim].set(p["b2"][0])

    return {"mem_t": mem_t, "mem_read": mem_read, "w_slab": w_slab,
            "bias_mask": bm,
            "meta": {"in_dim": in_dim, "hidden": hidden, "out_dim": out_dim,
                     "m_pad": m_pad, "memory_size": memory_size}}


def reference_forward(x, p):
    """Pure-JAX f32 reference using the same (bf16-stored) parameters."""
    f32 = jnp.float32
    mem = p["memory"].astype(f32)                                  # [M, H]
    d = lambda a, b: jnp.dot(a.astype(f32), b.astype(f32))

    h = jnp.maximum(d(x, p["w_enc"]) + p["b_enc"], 0.0)
    s = h @ mem.T
    s = s - jnp.max(s, axis=-1, keepdims=True)
    a = jnp.exp(s)
    a = a / jnp.sum(a, axis=-1, keepdims=True)
    mf = h + a @ mem
    tr = jnp.maximum(d(mf, p["w_tr"]) + p["b_tr"], 0.0)
    en = tr + jnp.maximum(d(tr, p["w_ct"]) + p["b_ct"], 0.0)
    z = jnp.maximum(d(en, p["w1"]) + p["b1"], 0.0)
    return d(z, p["w2"]) + p["b2"]


if __name__ == "__main__":
    B, INPUT_DIM, HIDDEN_DIM, OUTPUT_DIM = 8, 16, 32, 8
    MEMORY_SIZE = 1000  # per module __init__

    key = jax.random.PRNGKey(0)
    kx, kp = jax.random.split(key)
    x = jax.random.normal(kx, (B, INPUT_DIM), jnp.float32)
    params = init_params(kp, INPUT_DIM, HIDDEN_DIM, OUTPUT_DIM, MEMORY_SIZE)
    packed = pack_params(params)

    out = jax.block_until_ready(memory_enhanced_model(x, packed))
    ref = reference_forward(x, params)

    assert out.shape == (B, OUTPUT_DIM)
    # Tolerance accounts for bf16 operand quantization (f32 accumulation) and the
    # approx reciprocal on the softmax denominator -- both intentional.
    assert jnp.allclose(out, ref, rtol=5e-2, atol=5e-2), "mismatch vs JAX reference"

    print("KERNEL_OK")
</pallas_src>

<mosaic_0001>
module attributes {stable_mosaic.version = 11 : i64} {
  func.func @_fused_kernel(%arg0: memref<8x16xbf16, #tpu.memory_space<vmem>>, %arg1: memref<32x1024xbf16, #tpu.memory_space<vmem>>, %arg2: memref<1024x32xbf16, #tpu.memory_space<vmem>>, %arg3: memref<160x128xbf16, #tpu.memory_space<vmem>>, %arg4: memref<1x1664xf32, #tpu.memory_space<vmem>>, %arg5: memref<8x128xf32, #tpu.memory_space<vmem>>) attributes {dimension_semantics = [], scalar_prefetch = 0 : i64, scratch_operands = 0 : i64, tpu.core_type = #tpu.core_type<tc>} {
    %c0 = arith.constant 0 : index
    %c0_0 = arith.constant 0 : index
    %0 = vector.load %arg4[%c0, %c0_0] : memref<1x1664xf32, #tpu.memory_space<vmem>>, vector<1x1024xf32>
    %c0_1 = arith.constant 0 : index
    %c1024 = arith.constant 1024 : index
    %1 = vector.load %arg4[%c0_1, %c1024] : memref<1x1664xf32, #tpu.memory_space<vmem>>, vector<1x32xf32>
    %c0_2 = arith.constant 0 : index
    %c1152 = arith.constant 1152 : index
    %2 = vector.load %arg4[%c0_2, %c1152] : memref<1x1664xf32, #tpu.memory_space<vmem>>, vector<1x32xf32>
    %c0_3 = arith.constant 0 : index
    %c1280 = arith.constant 1280 : index
    %3 = vector.load %arg4[%c0_3, %c1280] : memref<1x1664xf32, #tpu.memory_space<vmem>>, vector<1x32xf32>
    %c0_4 = arith.constant 0 : index
    %c1408 = arith.constant 1408 : index
    %4 = vector.load %arg4[%c0_4, %c1408] : memref<1x1664xf32, #tpu.memory_space<vmem>>, vector<1x32xf32>
    %c0_5 = arith.constant 0 : index
    %c1536 = arith.constant 1536 : index
    %5 = vector.load %arg4[%c0_5, %c1536] : memref<1x1664xf32, #tpu.memory_space<vmem>>, vector<1x128xf32>
    %c0_6 = arith.constant 0 : index
    %c0_7 = arith.constant 0 : index
    %6 = vector.load %arg3[%c0_6, %c0_7] : memref<160x128xbf16, #tpu.memory_space<vmem>>, vector<16x32xbf16>
    %c32 = arith.constant 32 : index
    %c0_8 = arith.constant 0 : index
    %7 = vector.load %arg3[%c32, %c0_8] : memref<160x128xbf16, #tpu.memory_space<vmem>>, vector<32x32xbf16>
    %c64 = arith.constant 64 : index
    %c0_9 = arith.constant 0 : index
    %8 = vector.load %arg3[%c64, %c0_9] : memref<160x128xbf16, #tpu.memory_space<vmem>>, vector<32x32xbf16>
    %c96 = arith.constant 96 : index
    %c0_10 = arith.constant 0 : index
    %9 = vector.load %arg3[%c96, %c0_10] : memref<160x128xbf16, #tpu.memory_space<vmem>>, vector<32x32xbf16>
    %c128 = arith.constant 128 : index
    %c0_11 = arith.constant 0 : index
    %10 = vector.load %arg3[%c128, %c0_11] : memref<160x128xbf16, #tpu.memory_space<vmem>>, vector<32x128xbf16>
    %c0_12 = arith.constant 0 : index
    %c0_13 = arith.constant 0 : index
    %11 = vector.load %arg0[%c0_12, %c0_13] : memref<8x16xbf16, #tpu.memory_space<vmem>>, vector<8x16xbf16>
    %cst = arith.constant dense<0.000000e+00> : vector<8x32xf32>
    %12 = tpu.matmul %11, %6, %cst {dimension_numbers = #tpu.dot_dimension_numbers<[1], [0], [0], [1], [0, 0, 1, 1], [], []>} : vector<8x16xbf16>, vector<16x32xbf16>, vector<8x32xf32> -> vector<8x32xf32>
    %13 = vector.broadcast %1 : vector<1x32xf32> to vector<8x32xf32>
    %14 = arith.addf %12, %13 : vector<8x32xf32>
    %cst_14 = arith.constant 0.000000e+00 : f32
    %15 = vector.broadcast %cst_14 : f32 to vector<8x32xf32>
    %16 = arith.maximumf %14, %15 : vector<8x32xf32>
    %17 = arith.truncf %16 : vector<8x32xf32> to vector<8x32xbf16>
    %c0_15 = arith.constant 0 : index
    %c0_16 = arith.constant 0 : index
    %18 = vector.load %arg1[%c0_15, %c0_16] : memref<32x1024xbf16, #tpu.memory_space<vmem>>, vector<32x1024xbf16>
    %cst_17 = arith.constant dense<0.000000e+00> : vector<8x1024xf32>
    %19 = tpu.matmul %17, %18, %cst_17 {dimension_numbers = #tpu.dot_dimension_numbers<[1], [0], [0], [1], [0, 0, 1, 1], [], []>} : vector<8x32xbf16>, vector<32x1024xbf16>, vector<8x1024xf32> -> vector<8x1024xf32>
    %20 = vector.broadcast %0 : vector<1x1024xf32> to vector<8x1024xf32>
    %21 = arith.addf %19, %20 : vector<8x1024xf32>
    %cst_18 = arith.constant dense<0xFF800000> : vector<8xf32>
    %22 = vector.multi_reduction <maximumf>, %21, %cst_18 [1] : vector<8x1024xf32> to vector<8xf32>
    %23 = vector.shape_cast %22 : vector<8xf32> to vector<8x1xf32>
    %24 = vector.broadcast %23 : vector<8x1xf32> to vector<8x1024xf32>
    %25 = arith.subf %21, %24 : vector<8x1024xf32>
    %26 = math.exp %25 : vector<8x1024xf32>
    %cst_19 = arith.constant dense<0.000000e+00> : vector<8xf32>
    %27 = vector.multi_reduction <add>, %26, %cst_19 [1] : vector<8x1024xf32> to vector<8xf32>
    %28 = vector.shape_cast %27 : vector<8xf32> to vector<8x1xf32>
    %29 = tpu.reciprocal %28 {approx = true} : vector<8x1xf32> -> vector<8x1xf32>
    %30 = arith.truncf %26 : vector<8x1024xf32> to vector<8x1024xbf16>
    %c0_20 = arith.constant 0 : index
    %c0_21 = arith.constant 0 : index
    %31 = vector.load %arg2[%c0_20, %c0_21] : memref<1024x32xbf16, #tpu.memory_space<vmem>>, vector<1024x32xbf16>
    %cst_22 = arith.constant dense<0.000000e+00> : vector<8x32xf32>
    %32 = tpu.matmul %30, %31, %cst_22 {dimension_numbers = #tpu.dot_dimension_numbers<[1], [0], [0], [1], [0, 0, 1, 1], [], []>} : vector<8x1024xbf16>, vector<1024x32xbf16>, vector<8x32xf32> -> vector<8x32xf32>
    %33 = vector.broadcast %29 : vector<8x1xf32> to vector<8x32xf32>
    %34 = arith.mulf %32, %33 : vector<8x32xf32>
    %35 = arith.addf %16, %34 : vector<8x32xf32>
    %36 = arith.truncf %35 : vector<8x32xf32> to vector<8x32xbf16>
    %cst_23 = arith.constant dense<0.000000e+00> : vector<8x32xf32>
    %37 = tpu.matmul %36, %7, %cst_23 {dimension_numbers = #tpu.dot_dimension_numbers<[1], [0], [0], [1], [0, 0, 1, 1], [], []>} : vector<8x32xbf16>, vector<32x32xbf16>, vector<8x32xf32> -> vector<8x32xf32>
    %38 = vector.broadcast %2 : vector<1x32xf32> to vector<8x32xf32>
    %39 = arith.addf %37, %38 : vector<8x32xf32>
    %cst_24 = arith.constant 0.000000e+00 : f32
    %40 = vector.broadcast %cst_24 : f32 to vector<8x32xf32>
    %41 = arith.maximumf %39, %40 : vector<8x32xf32>
    %42 = arith.truncf %41 : vector<8x32xf32> to vector<8x32xbf16>
    %cst_25 = arith.constant dense<0.000000e+00> : vector<8x32xf32>
    %43 = tpu.matmul %42, %8, %cst_25 {dimension_numbers = #tpu.dot_dimension_numbers<[1], [0], [0], [1], [0, 0, 1, 1], [], []>} : vector<8x32xbf16>, vector<32x32xbf16>, vector<8x32xf32> -> vector<8x32xf32>
    %44 = vector.broadcast %3 : vector<1x32xf32> to vector<8x32xf32>
    %45 = arith.addf %43, %44 : vector<8x32xf32>
    %cst_26 = arith.constant 0.000000e+00 : f32
    %46 = vector.broadcast %cst_26 : f32 to vector<8x32xf32>
    %47 = arith.maximumf %45, %46 : vector<8x32xf32>
    %48 = arith.addf %41, %47 : vector<8x32xf32>
    %49 = arith.truncf %48 : vector<8x32xf32> to vector<8x32xbf16>
    %cst_27 = arith.constant dense<0.000000e+00> : vector<8x32xf32>
    %50 = tpu.matmul %49, %9, %cst_27 {dimension_numbers = #tpu.dot_dimension_numbers<[1], [0], [0], [1], [0, 0, 1, 1], [], []>} : vector<8x32xbf16>, vector<32x32xbf16>, vector<8x32xf32> -> vector<8x32xf32>
    %51 = vector.broadcast %4 : vector<1x32xf32> to vector<8x32xf32>
    %52 = arith.addf %50, %51 : vector<8x32xf32>
    %cst_28 = arith.constant 0.000000e+00 : f32
    %53 = vector.broadcast %cst_28 : f32 to vector<8x32xf32>
    %54 = arith.maximumf %52, %53 : vector<8x32xf32>
    %55 = arith.truncf %54 : vector<8x32xf32> to vector<8x32xbf16>
    %cst_29 = arith.constant dense<0.000000e+00> : vector<8x128xf32>
    %56 = tpu.matmul %55, %10, %cst_29 {dimension_numbers = #tpu.dot_dimension_numbers<[1], [0], [0], [1], [0, 0, 1, 1], [], []>} : vector<8x32xbf16>, vector<32x128xbf16>, vector<8x128xf32> -> vector<8x128xf32>
    %57 = vector.broadcast %5 : vector<1x128xf32> to vector<8x128xf32>
    %58 = arith.addf %56, %57 : vector<8x128xf32>
    %c0_30 = arith.constant 0 : index
    %c0_31 = arith.constant 0 : index
    %59 = vector.load %arg5[%c0_30, %c0_31] : memref<8x128xf32, #tpu.memory_space<vmem>>, vector<8x128xf32>
    tpu.vector_store %arg5[%c0_30, %c0_31], %58 {strides = array<i32>} : memref<8x128xf32, #tpu.memory_space<vmem>>, vector<8x128xf32>,
    return
  }
}

</mosaic_0001>

<bundles_post_ra>
// kernel: tpu_custom_call.1
= control target key start
LH: loop header
LB: loop body
LE: loop exit
PB: predicated region body
PF: predicated region fallthrough
CT: control target
= control target key end

     0   :  { %vm56_vm0 = vcmask 130048   ;;  %s2047_s0 = inlined_call_operand.vmem [shape: bf16[8,16], index: 0, kind: input, shape index: {}]   ;;  %s2048_s1 = inlined_call_operand.vmem [shape: bf16[32,1024], index: 1, kind: input, shape index: {}]   ;;  %s2049_s2 = inlined_call_operand.vmem [shape: bf16[1024,32], index: 2, kind: input, shape index: {}]   ;;  %s2050_s3 = inlined_call_operand.vmem [shape: bf16[160,128], index: 3, kind: input, shape index: {}]   ;;  %s2051_s4 = inlined_call_operand.vmem [shape: f32[1,1664], index: 4, kind: input, shape index: {}]   ;;  %s2052_s5 = inlined_call_operand.hbm [shape: f32[8,128], index: 5, kind: output, shape index: {}]  }
   0x1   :  { %v1483_v0 = vld [vmem:[%s2050_s3] sm:$0xff]  ;;  %v1501_v2 = vld [vmem:[%s2048_s1 + $0x4c] sm:$0xf] }
   0x2   :  { %v46_v1 = vld [vmem:[%s2047_s0] sm:$0xf]  ;;  %v1163_v3 = vld [vmem:[%s2048_s1 + $0x68] sm:$0xf0]  ;;  %67 = vmatpush.bf16.msra.mxu0 %v1483_v0 }
   0x3   :  { %v1166_v4 = vor.u32 %v1501_v2, %v1163_v3 }
   0x4   :  { %10 = vsyncpa [#allocation3], 0  ;;  %v1153_v5 = vld [vmem:[%s2048_s1 + $0x40] sm:$0xf]  ;;  %v1500_v7 = vld [vmem:[%s2048_s1 + $0x44] sm:$0xf] }
   0x5   :  { %1118 = vmatmul.msk.bf16.vlgmr.msra.gmra.mxu0 %vm56_vm0, %v46_v1  ;;  %v1504_v6 = vld [vmem:[%s2048_s1 + $0x5c] sm:$0xf0]  ;;  %v1155_v9 = vld [vmem:[%s2048_s1 + $0x60] sm:$0xf0]  ;;  %v1161_v10 = vld [vmem:[%s2048_s1 + $0x48] sm:$0xf] }
   0x6   :  { %237 = vmatpush.bf16.msrb.mxu0 %v1166_v4  ;;  %v1154_v8 = vor.u32 %v1504_v6, %v1153_v5  ;;  %v1505_v11 = vld [vmem:[%s2048_s1 + $0x64] sm:$0xf0]  ;;  %v1158_v12 = vor.u32 %v1500_v7, %v1155_v9  ;;  %v1121_v14 = vld [vmem:[%s2048_s1] sm:$0xf]  ;;  %v1492_v16 = vld [vmem:[%s2048_s1 + $0x4] sm:$0xf] }
   0x7   :  { %v1162_v13 = vor.u32 %v1505_v11, %v1161_v10  ;;  %v1496_v15 = vld [vmem:[%s2048_s1 + $0x1c] sm:$0xf0]  ;;  %v1123_v18 = vld [vmem:[%s2048_s1 + $0x20] sm:$0xf0]  ;;  %v1129_v19 = vld [vmem:[%s2048_s1 + $0x8] sm:$0xf] }
   0x8   :  { %198 = vmatpush.bf16.msra.mxu1 %v1154_v8  ;;  %211 = vmatpush.bf16.msra.mxu2 %v1158_v12  ;;  %v1122_v17 = vor.u32 %v1496_v15, %v1121_v14  ;;  %v1497_v20 = vld [vmem:[%s2048_s1 + $0x24] sm:$0xf0]  ;;  %v1126_v21 = vor.u32 %v1492_v16, %v1123_v18  ;;  %v1493_v23 = vld [vmem:[%s2048_s1 + $0xc] sm:$0xf]  ;;  %v1502_v26 = vld [vmem:[%s2048_s1 + $0x54] sm:$0xf] }
   0x9   :  { %224 = vmatpush.bf16.msra.mxu3 %v1162_v13  ;;  %v1130_v22 = vor.u32 %v1497_v20, %v1129_v19  ;;  %v1131_v24 = vld [vmem:[%s2048_s1 + $0x28] sm:$0xf0]  ;;  %v1171_v27 = vld [vmem:[%s2048_s1 + $0x70] sm:$0xf0]  ;;  %v1177_v28 = vld [vmem:[%s2048_s1 + $0x58] sm:$0xf] }
   0xa   :  { %v1134_v25 = vor.u32 %v1493_v23, %v1131_v24  ;;  %v1174_v29 = vor.u32 %v1502_v26, %v1171_v27  ;;  %v1507_v30 = vld [vmem:[%s2048_s1 + $0x74] sm:$0xf0]  ;;  %v1169_v31 = vld [vmem:[%s2048_s1 + $0x50] sm:$0xf]  ;;  %v1503_v35 = vld [vmem:[%s2048_s1 + $0x5c] sm:$0xf] }
   0xb   :  { %v1506_v32 = vld [vmem:[%s2048_s1 + $0x6c] sm:$0xf0]  ;;  %v1178_v33 = vor.u32 %v1507_v30, %v1177_v28  ;;  %v1179_v36 = vld [vmem:[%s2048_s1 + $0x78] sm:$0xf0]  ;;  %v1494_v37 = vld [vmem:[%s2048_s1 + $0x14] sm:$0xf] }
   0xc   :  { %199 = vmatpush.bf16.msra.mxu1 %v1122_v17  ;;  %212 = vmatpush.bf16.msra.mxu2 %v1126_v21  ;;  %v1170_v34 = vor.u32 %v1506_v32, %v1169_v31  ;;  %v1182_v38 = vor.u32 %v1503_v35, %v1179_v36  ;;  %v1139_v39 = vld [vmem:[%s2048_s1 + $0x30] sm:$0xf0]  ;;  %v1145_v40 = vld [vmem:[%s2048_s1 + $0x18] sm:$0xf]  ;;  %v1137_v44 = vld [vmem:[%s2048_s1 + $0x10] sm:$0xf] }
   0xd   :  { %225 = vmatpush.bf16.msra.mxu3 %v1130_v22  ;;  %238 = vmatpush.bf16.msrb.mxu0 %v1134_v25  ;;  %v1499_v41 = vld [vmem:[%s2048_s1 + $0x34] sm:$0xf0]  ;;  %v1142_v42 = vor.u32 %v1494_v37, %v1139_v39  ;;  %v1498_v45 = vld [vmem:[%s2048_s1 + $0x2c] sm:$0xf0]  ;;  %v1495_v46 = vld [vmem:[%s2048_s1 + $0x1c] sm:$0xf] }
   0xe   :  { %v1146_v43 = vor.u32 %v1499_v41, %v1145_v40  ;;  %v1138_v47 = vor.u32 %v1498_v45, %v1137_v44  ;;  %v1147_v48 = vld [vmem:[%s2048_s1 + $0x38] sm:$0xf0]  ;;  %v1573_v50 = vld [vmem:[%s2051_s4 + $0x8] ss:$0 sm:$0xff]  ;;  %vm188_vm1 = vcmask 261120   ;;  %v1514_v62 = vld [vmem:[%s2049_s2 + $0x30] sm:$0xff] }
   0xf   :  { %v1150_v49 = vor.u32 %v1495_v46, %v1147_v48  ;;  %v1515_v57 = vld [vmem:[%s2049_s2 + $0x38] sm:$0xff]  ;;  %v1522_v63 = vld [vmem:[%s2049_s2 + $0x70] sm:$0xff]  ;;  %v1513_v3 = vld [vmem:[%s2049_s2 + $0x28] sm:$0xff]  ;;  %s1622_s26 = smov [#allocation2]   ;;  %s1105_s29 = sshll.u32 %s2052_s5, 4  ;;  %s1106_s29 = int_to_ptr.hbm [resolvable:$true] %s1105_s29 }
  0x10   :  { %263 = vmatpush.bf16.msrb.mxu2 %v1174_v29  ;;  %250 = vmatpush.bf16.msrb.mxu1 %v1170_v34  ;;  %v1523_v58 = vld [vmem:[%s2049_s2 + $0x78] sm:$0xff]  ;;  %v1530_v0 = vld [vmem:[%s2049_s2 + $0xb0] sm:$0xff]  ;;  %v1521_v4 = vld [vmem:[%s2049_s2 + $0x68] sm:$0xff]  ;;  %s1103_s27 = sshll.u32 %s1622_s26, 4  ;;  %s1104_s27 = int_to_ptr.vmem [resolvable:$true] %s1103_s27 }
  0x11   :  { %276 = vmatpush.bf16.msrb.mxu3 %v1178_v33  ;;  %289 = vmatpush.bf16.msra.mxu0 %v1182_v38  ;;  %v1531_v59 = vld [vmem:[%s2049_s2 + $0xb8] sm:$0xff]  ;;  %v1538_v1 = vld [vmem:[%s2049_s2 + $0xf0] sm:$0xff]  ;;  %v1529_v6 = vld [vmem:[%s2049_s2 + $0xa8] sm:$0xff] }
  0x12   :  { %v1539_v61 = vld [vmem:[%s2049_s2 + $0xf8] sm:$0xff]  ;;  %v1537_v7 = vld [vmem:[%s2049_s2 + $0xe8] sm:$0xff]  ;;  %v1512_v10 = vld [vmem:[%s2049_s2 + $0x20] sm:$0xff] }
  0x13   :  { %v1520_v11 = vld [vmem:[%s2049_s2 + $0x60] sm:$0xff]  ;;  %v1511_v15 = vld [vmem:[%s2049_s2 + $0x18] sm:$0xff]  ;;  %v1510_v25 = vld [vmem:[%s2049_s2 + $0x10] sm:$0xff] }
  0x14   :  { %264 = vmatpush.bf16.msrb.mxu2 %v1142_v42  ;;  %251 = vmatpush.bf16.msrb.mxu1 %v1138_v47  ;;  %v1528_v12 = vld [vmem:[%s2049_s2 + $0xa0] sm:$0xff]  ;;  %v1519_v16 = vld [vmem:[%s2049_s2 + $0x58] sm:$0xff]  ;;  %v1518_v26 = vld [vmem:[%s2049_s2 + $0x50] sm:$0xff] }
  0x15   :  { %277 = vmatpush.bf16.msrb.mxu3 %v1146_v43  ;;  %290 = vmatpush.bf16.msra.mxu0 %v1150_v49  ;;  %v1536_v13 = vld [vmem:[%s2049_s2 + $0xe0] sm:$0xff]  ;;  %v1527_v18 = vld [vmem:[%s2049_s2 + $0x98] sm:$0xff]  ;;  %v1526_v30 = vld [vmem:[%s2049_s2 + $0x90] sm:$0xff] }
  0x16   :  { %v1535_v19 = vld [vmem:[%s2049_s2 + $0xd8] sm:$0xff]  ;;  %v22_v20 = vld [vmem:[%s2051_s4] sm:$0xff]  ;;  %v1534_v31 = vld [vmem:[%s2049_s2 + $0xd0] sm:$0xff] }
  0x17   :  { %v96_v22 = vperm.slane %v22_v20, 4  ;;  %v99_v24 = vperm.slane %v22_v20, 7  ;;  %v92_v27 = vperm.slane %v22_v20, 0  ;;  %v93_v28 = vperm.slane %v22_v20, 1  ;;  %v1509_v38 = vld [vmem:[%s2049_s2 + $0x8] sm:$0xff] }
  0x18   :  { %v97_v29 = vperm.slane %v22_v20, 5  ;;  %v95_v32 = vperm.slane %v22_v20, 3  ;;  %v94_v33 = vperm.slane %v22_v20, 2  ;;  %v98_v34 = vperm.slane %v22_v20, 6  ;;  %v1517_v39 = vld [vmem:[%s2049_s2 + $0x48] sm:$0xff]  ;;  %v1567_v20 = vld [vmem:[%s2049_s2 + $0x1d8] sm:$0xff] }
  0x19   :  { %v1525_v44 = vld [vmem:[%s2049_s2 + $0x88] sm:$0xff] }
  0x1a   :  { %v1533_v45 = vld [vmem:[%s2049_s2 + $0xc8] sm:$0xff] }
  0x82   :  { %v69_v51 = vpop.f32.mrf.mxu0 }
  0x83   :  { %v70_v52 = vadd.f32 %v1573_v50, %v69_v51 }
  0x85   :  { %v1758_v53 = vmax.f32 %v70_v52, 0.0 }
  0x87   :  { %v74_v54 = vpack.c.bf16 %v1758_v53, %v1758_v53 }
  0x89   :  { %1183 = vmatmul.msk.bf16.vlgmr.msra.gmra.mxu1 %vm188_vm1, %v74_v54  ;;  %1184 = vmatmul.msk.bf16.vlgmr.msra.gmra.mxu2 %vm188_vm1, %v74_v54 }
  0x8a   :  { %1185 = vmatmul.msk.bf16.vlgmr.msra.gmra.mxu3 %vm188_vm1, %v74_v54  ;;  %1186 = vmatmul.msk.bf16.vlgmr.msrb.gmra.mxu0 %vm188_vm1, %v74_v54  ;;  %v71_v55 = vpop.f32.mrf.mxu0 }
  0x8b   :  { %859 = vmatpush.bf16.msra.mxu1 %v1515_v57  ;;  %872 = vmatpush.bf16.msra.mxu2 %v1523_v58  ;;  %v1516_v57 = vld [vmem:[%s2049_s2 + $0x40] sm:$0xff] }
  0x8c   :  { %885 = vmatpush.bf16.msra.mxu3 %v1531_v59  ;;  %898 = vmatpush.bf16.msrb.mxu0 %v1539_v61  ;;  %v1524_v59 = vld [vmem:[%s2049_s2 + $0x80] sm:$0xff] }
  0x8f   :  { %860 = vmatpush.bf16.msra.mxu1 %v1514_v62  ;;  %873 = vmatpush.bf16.msra.mxu2 %v1522_v63  ;;  %v1547_v62 = vld [vmem:[%s2049_s2 + $0x138] sm:$0xff] }
  0x90   :  { %886 = vmatpush.bf16.msra.mxu3 %v1530_v0  ;;  %899 = vmatpush.bf16.msrb.mxu0 %v1538_v1  ;;  %v1555_v63 = vld [vmem:[%s2049_s2 + $0x178] sm:$0xff] }
  0x91   :  { %v1563_v0 = vld [vmem:[%s2049_s2 + $0x1b8] sm:$0xff] }
  0x93   :  { %861 = vmatpush.bf16.msra.mxu1 %v1513_v3  ;;  %874 = vmatpush.bf16.msra.mxu2 %v1521_v4  ;;  %v1571_v3 = vld [vmem:[%s2049_s2 + $0x1f8] sm:$0xff] }
  0x94   :  { %887 = vmatpush.bf16.msra.mxu3 %v1529_v6  ;;  %900 = vmatpush.bf16.msrb.mxu0 %v1537_v7  ;;  %v1554_v6 = vld [vmem:[%s2049_s2 + $0x170] sm:$0xff] }
  0x95   :  { %v1562_v7 = vld [vmem:[%s2049_s2 + $0x1b0] sm:$0xff] }
  0x97   :  { %862 = vmatpush.bf16.msra.mxu1 %v1512_v10  ;;  %875 = vmatpush.bf16.msra.mxu2 %v1520_v11  ;;  %v1553_v10 = vld [vmem:[%s2049_s2 + $0x168] sm:$0xff] }
  0x98   :  { %888 = vmatpush.bf16.msra.mxu3 %v1528_v12  ;;  %901 = vmatpush.bf16.msrb.mxu0 %v1536_v13  ;;  %v1561_v11 = vld [vmem:[%s2049_s2 + $0x1a8] sm:$0xff]  ;;  %v1544_v13 = vld [vmem:[%s2049_s2 + $0x120] sm:$0xff] }
  0x99   :  { %1187 = vmatmul.msk.bf16.vlgmr.msrb.gmra.mxu1 %vm188_vm1, %v74_v54  ;;  %1188 = vmatmul.msk.bf16.vlgmr.msrb.gmra.mxu2 %vm188_vm1, %v74_v54  ;;  %v1569_v12 = vld [vmem:[%s2049_s2 + $0x1e8] sm:$0xff] }
  0x9a   :  { %1189 = vmatmul.msk.bf16.vlgmr.msrb.gmra.mxu3 %vm188_vm1, %v74_v54  ;;  %1190 = vmatmul.msk.bf16.vlgmr.msra.gmra.mxu0 %vm188_vm1, %v74_v54 }
  0x9b   :  { %863 = vmatpush.bf16.msra.mxu1 %v1511_v15  ;;  %876 = vmatpush.bf16.msra.mxu2 %v1519_v16  ;;  %v1560_v15 = vld [vmem:[%s2049_s2 + $0x1a0] sm:$0xff] }
  0x9c   :  { %889 = vmatpush.bf16.msra.mxu3 %v1527_v18  ;;  %902 = vmatpush.bf16.msrb.mxu0 %v1535_v19  ;;  %v1568_v16 = vld [vmem:[%s2049_s2 + $0x1e0] sm:$0xff]  ;;  %v1551_v18 = vld [vmem:[%s2049_s2 + $0x158] sm:$0xff] }
  0x9d   :  { %v1559_v19 = vld [vmem:[%s2049_s2 + $0x198] sm:$0xff] }
  0x9f   :  { %864 = vmatpush.bf16.msra.mxu1 %v1510_v25  ;;  %877 = vmatpush.bf16.msra.mxu2 %v1518_v26  ;;  %v1541_v25 = vld [vmem:[%s2049_s2 + $0x108] sm:$0xff] }
  0xa0   :  { %890 = vmatpush.bf16.msra.mxu3 %v1526_v30  ;;  %903 = vmatpush.bf16.msrb.mxu0 %v1534_v31  ;;  %v1549_v26 = vld [vmem:[%s2049_s2 + $0x148] sm:$0xff]  ;;  %v1548_v30 = vld [vmem:[%s2049_s2 + $0x140] sm:$0xff] }
  0xa1   :  { %v1556_v31 = vld [vmem:[%s2049_s2 + $0x180] sm:$0xff] }
  0xa3   :  { %865 = vmatpush.bf16.msra.mxu1 %v1509_v38  ;;  %878 = vmatpush.bf16.msra.mxu2 %v1517_v39 }
  0xa4   :  { %891 = vmatpush.bf16.msra.mxu3 %v1525_v44  ;;  %904 = vmatpush.bf16.msrb.mxu0 %v1533_v45 }
  0xa7   :  { %879 = vmatpush.bf16.msra.mxu2 %v1516_v57 }
  0xa8   :  { %892 = vmatpush.bf16.msra.mxu3 %v1524_v59 }
  0xab   :  { %924 = vmatpush.bf16.msrb.mxu2 %v1555_v63 }
  0xac   :  { %937 = vmatpush.bf16.msrb.mxu3 %v1563_v0 }
  0xaf   :  { %925 = vmatpush.bf16.msrb.mxu2 %v1554_v6 }
  0xb0   :  { %938 = vmatpush.bf16.msrb.mxu3 %v1562_v7 }
  0xb3   :  { %926 = vmatpush.bf16.msrb.mxu2 %v1553_v10  ;;  %v1485_v10 = vld [vmem:[%s2050_s3 + $0x18] sm:$0xff] }
  0xb4   :  { %939 = vmatpush.bf16.msrb.mxu3 %v1561_v11 }
  0xb8   :  { %940 = vmatpush.bf16.msrb.mxu3 %v1560_v15  ;;  %v1486_v15 = vld [vmem:[%s2050_s3 + $0x20] sm:$0xff] }
  0xbc   :  { %941 = vmatpush.bf16.msrb.mxu3 %v1559_v19 }
 0x106   :  { %v1770_v56 = vpop.f32.mrf.mxu1 }
 0x107   :  { %v1781_v60 = vpop.f32.mrf.mxu0  ;;  %v1860_v40 = vadd.f32 %v1770_v56, %v92_v27  ;;  %v1508_v56 = vld [vmem:[%s2049_s2] sm:$0xff]  ;;  %v1557_v27 = vld [vmem:[%s2049_s2 + $0x188] sm:$0xff] }
 0x108   :  { %v1873_v46 = vadd.f32 %v1781_v60, %v95_v32  ;;  %v1532_v60 = vld [vmem:[%s2049_s2 + $0xc0] sm:$0xff]  ;;  %866 = vmatpush.bf16.msra.mxu1 %v1508_v56 }
 0x109   :  { %905 = vmatpush.bf16.msrb.mxu0 %v1532_v60  ;;  %v1564_v32 = vld [vmem:[%s2049_s2 + $0x1c0] sm:$0xff] }
 0x10c   :  { %v214_v2 = vpop.f32.mrf.mxu2  ;;  %911 = vmatpush.bf16.msrb.mxu1 %v1547_v62 }
 0x10d   :  { %v227_v5 = vpop.f32.mrf.mxu3  ;;  %v1862_v41 = vadd.f32 %v214_v2, %v93_v28  ;;  %950 = vmatpush.bf16.msra.mxu0 %v1571_v3  ;;  %v1565_v28 = vld [vmem:[%s2049_s2 + $0x1c8] sm:$0xff] }
 0x10e   :  { %v203_v8 = vpop.f32.mrf.mxu1  ;;  %v1875_v47 = vadd.f32 %v227_v5, %v94_v33  ;;  %v1546_v5 = vld [vmem:[%s2049_s2 + $0x130] sm:$0xff] }
 0x10f   :  { %v242_v9 = vpop.f32.mrf.mxu0  ;;  %v1570_v8 = vld [vmem:[%s2049_s2 + $0x1f0] sm:$0xff] }
 0x110   :  { %912 = vmatpush.bf16.msrb.mxu1 %v1546_v5  ;;  %v1545_v9 = vld [vmem:[%s2049_s2 + $0x128] sm:$0xff] }
 0x111   :  { %951 = vmatpush.bf16.msra.mxu0 %v1570_v8 }
 0x114   :  { %v216_v14 = vpop.f32.mrf.mxu2  ;;  %913 = vmatpush.bf16.msrb.mxu1 %v1545_v9 }
 0x115   :  { %v229_v17 = vpop.f32.mrf.mxu3  ;;  %v1552_v14 = vld [vmem:[%s2049_s2 + $0x160] sm:$0xff]  ;;  %952 = vmatpush.bf16.msra.mxu0 %v1569_v12  ;;  %v1484_v12 = vld [vmem:[%s2050_s3 + $0x10] sm:$0xff] }
 0x116   :  { %v253_v21 = vpop.f32.mrf.mxu1  ;;  %927 = vmatpush.bf16.msrb.mxu2 %v1552_v14  ;;  %v1543_v17 = vld [vmem:[%s2049_s2 + $0x118] sm:$0xff]  ;;  %v1487_v14 = vld [vmem:[%s2050_s3 + $0x28] sm:$0xff] }
 0x117   :  { %v292_v23 = vpop.f32.mrf.mxu0  ;;  %v1849_v35 = vadd.f32 %v253_v21, %v96_v22  ;;  %v1542_v21 = vld [vmem:[%s2049_s2 + $0x110] sm:$0xff] }
 0x118   :  { %v1851_v36 = vadd.f32 %v292_v23, %v99_v24  ;;  %914 = vmatpush.bf16.msrb.mxu1 %v1544_v13  ;;  %v1550_v22 = vld [vmem:[%s2049_s2 + $0x150] sm:$0xff] }
 0x119   :  { %v296_v50 = vmax.f32 %v1860_v40, %v1849_v35  ;;  %953 = vmatpush.bf16.msra.mxu0 %v1568_v16  ;;  %v1558_v23 = vld [vmem:[%s2049_s2 + $0x190] sm:$0xff] }
 0x11a   :  { %v299_v54 = vmax.f32 %v1873_v46, %v1851_v36  ;;  %928 = vmatpush.bf16.msrb.mxu2 %v1551_v18  ;;  %v1566_v24 = vld [vmem:[%s2049_s2 + $0x1d0] sm:$0xff]  ;;  %942 = vmatpush.bf16.msrb.mxu3 %v1558_v23 }
 0x11c   :  { %v266_v37 = vpop.f32.mrf.mxu2  ;;  %915 = vmatpush.bf16.msrb.mxu1 %v1543_v17 }
 0x11d   :  { %v1864_v42 = vadd.f32 %v266_v37, %v97_v29  ;;  %v279_v43 = vpop.f32.mrf.mxu3  ;;  %954 = vmatpush.bf16.msra.mxu0 %v1567_v20  ;;  %v1540_v29 = vld [vmem:[%s2049_s2 + $0x100] sm:$0xff] }
 0x11e   :  { %v1877_v48 = vadd.f32 %v279_v43, %v98_v34  ;;  %v255_v49 = vpop.f32.mrf.mxu1  ;;  %929 = vmatpush.bf16.msrb.mxu2 %v1550_v22  ;;  %943 = vmatpush.bf16.msrb.mxu3 %v1557_v27 }
 0x11f   :  { %v297_v51 = vmax.f32 %v1862_v41, %v1864_v42  ;;  %v294_v52 = vpop.f32.mrf.mxu0 }
 0x120   :  { %v298_v55 = vmax.f32 %v1875_v47, %v1877_v48  ;;  %916 = vmatpush.bf16.msrb.mxu1 %v1542_v21 }
 0x121   :  { %v300_v58 = vmax.f32 %v296_v50, %v297_v51  ;;  %955 = vmatpush.bf16.msra.mxu0 %v1566_v24 }
 0x122   :  { %v301_v61 = vmax.f32 %v298_v55, %v299_v54  ;;  %930 = vmatpush.bf16.msrb.mxu2 %v1549_v26  ;;  %944 = vmatpush.bf16.msrb.mxu3 %v1556_v31 }
 0x124   :  { %v268_v1 = vpop.f32.mrf.mxu2  ;;  %v302_v2 = vmax.f32 %v300_v58, %v301_v61  ;;  %917 = vmatpush.bf16.msrb.mxu1 %v1541_v25 }
 0x125   :  { %v281_v4 = vpop.f32.mrf.mxu3  ;;  %956 = vmatpush.bf16.msra.mxu0 %v1565_v28 }
 0x126   :  { %303 = vmax.xlane.f32.xlu0 %v302_v2  ;;  %931 = vmatpush.bf16.msrb.mxu2 %v1548_v30 }
 0x128   :  { %918 = vmatpush.bf16.msrb.mxu1 %v1540_v29 }
 0x129   :  { %957 = vmatpush.bf16.msra.mxu0 %v1564_v32 }
 0x199   :  { %v304_v33 = vpop.xlane.xlu0 %303 }
 0x19a   :  { %v305_v34 = vsub.f32 %v1860_v40, %v304_v33  ;;  %v306_v37 = vsub.f32 %v1862_v41, %v304_v33  ;;  %v307_v38 = vsub.f32 %v1875_v47, %v304_v33  ;;  %v308_v39 = vsub.f32 %v1873_v46, %v304_v33 }
 0x19b   :  { %v309_v50 = vsub.f32 %v1849_v35, %v304_v33  ;;  %v310_v51 = vsub.f32 %v1864_v42, %v304_v33  ;;  %v311_v40 = vsub.f32 %v1877_v48, %v304_v33  ;;  %v312_v41 = vsub.f32 %v1851_v36, %v304_v33 }
 0x19c   :  { %v313_v43 = vmul.f32 1.442695, %v305_v34  ;;  %v315_v44 = vmul.f32 1.442695, %v306_v37  ;;  %v317_v45 = vmul.f32 1.442695, %v307_v38 }
 0x19d   :  { %v319_v49 = vmul.f32 1.442695, %v308_v39  ;;  %v321_v52 = vmul.f32 1.442695, %v309_v50  ;;  %v323_v47 = vmul.f32 1.442695, %v310_v51 }
 0x19e   :  { %1578 = vpow2.f32 %v313_v43  ;;  %v325_v56 = vmul.f32 1.442695, %v311_v40  ;;  %v327_v42 = vmul.f32 1.442695, %v312_v41  ;;  %v1489_v50 = vld [vmem:[%s2050_s3 + $0x38] sm:$0xff] }
 0x19f   :  { %1580 = vpow2.f32 %v315_v44  ;;  %v1574_v51 = vld [vmem:[%s2051_s4 + $0x9] ss:$0 sm:$0xff] }
 0x1a0   :  { %1582 = vpow2.f32 %v317_v45 }
 0x1a1   :  { %1584 = vpow2.f32 %v319_v49 }
 0x1a2   :  { %1586 = vpow2.f32 %v321_v52 }
 0x1a3   :  { %1588 = vpow2.f32 %v323_v47 }
 0x1a4   :  { %v1579_v54 = vpop.eup %1578  ;;  %1590 = vpow2.f32 %v325_v56  ;;  %v1575_v56 = vld [vmem:[%s2051_s4 + $0xa] ss:$0 sm:$0xff] }
 0x1a5   :  { %v1581_v46 = vpop.eup %1580  ;;  %v339_v55 = vpack.c.bf16 %v1579_v54, %v1579_v54  ;;  %1592 = vpow2.f32 %v327_v42 }
 0x1a6   :  { %v1583_v57 = vpop.eup %1582  ;;  %v340_v58 = vpack.c.bf16 %v1581_v46, %v1581_v46  ;;  %v329_v35 = vadd.f32 %v1581_v46, %v1579_v54  ;;  %v1488_v54 = vld [vmem:[%s2050_s3 + $0x30] sm:$0xff]  ;;  %v1491_v46 = vld [vmem:[%s2050_s3 + $0x48] sm:$0xff] }
 0x1a7   :  { %v1585_v59 = vpop.eup %1584  ;;  %867 = vmatmul.bf16.vlgmr.msra.gmra.mxu1 %v339_v55  ;;  %v341_v60 = vpack.c.bf16 %v1583_v57, %v1583_v57  ;;  %v1490_v55 = vld [vmem:[%s2050_s3 + $0x40] sm:$0xff] }
 0x1a8   :  { %880 = vmatmul.bf16.vlgmr.msra.gmra.mxu2 %v340_v58  ;;  %v342_v61 = vpack.c.bf16 %v1585_v59, %v1585_v59  ;;  %v330_v48 = vadd.f32 %v1583_v57, %v329_v35  ;;  %v1587_v62 = vpop.eup %1586  ;;  %990 = vmatpush.bf16.msra.mxu1 %v1485_v10 }
 0x1a9   :  { %893 = vmatmul.bf16.vlgmr.msra.gmra.mxu3 %v341_v60  ;;  %v1589_v0 = vpop.eup %1588  ;;  %v343_v6 = vpack.c.bf16 %v1587_v62, %v1587_v62  ;;  %1023 = vmatpush.bf16.msra.mxu2 %v1487_v14 }
 0x1aa   :  { %906 = vmatmul.bf16.vlgmr.msrb.gmra.mxu0 %v342_v61  ;;  %v331_v36 = vadd.f32 %v1585_v59, %v330_v48  ;;  %v1591_v2 = vpop.eup %1590  ;;  %v344_v7 = vpack.c.bf16 %v1589_v0, %v1589_v0  ;;  %1057 = vmatpush.bf16.msra.mxu3 %v1489_v50  ;;  %v1576_v61 = vld [vmem:[%s2051_s4 + $0xb] ss:$0 sm:$0xff] }
 0x1ab   :  { %v1593_v4 = vpop.eup %1592  ;;  %v345_v8 = vpack.c.bf16 %v1591_v2, %v1591_v2  ;;  %1090 = vmatpush.bf16.msrb.mxu0 %v1491_v46 }
 0x1ac   :  { %v332_v63 = vadd.f32 %v1587_v62, %v331_v36  ;;  %v346_v9 = vpack.c.bf16 %v1593_v4, %v1593_v4  ;;  %991 = vmatpush.bf16.msra.mxu1 %v1484_v12 }
 0x1ad   :  { %1024 = vmatpush.bf16.msra.mxu2 %v1486_v15 }
 0x1ae   :  { %v333_v1 = vadd.f32 %v1589_v0, %v332_v63  ;;  %1058 = vmatpush.bf16.msra.mxu3 %v1488_v54 }
 0x1af   :  { %1091 = vmatpush.bf16.msrb.mxu0 %v1490_v55 }
 0x1b0   :  { %v334_v3 = vadd.f32 %v1591_v2, %v333_v1  ;;  %v1577_v1 = vld [vmem:[%s2051_s4 + $0xc] ss:$0 sm:$0xff] }
 0x1b2   :  { %v335_v5 = vadd.f32 %v1593_v4, %v334_v3 }
 0x1b4   :  { %336 = vadd.xlane.f32.xlu0 %v335_v5 }
 0x1b7   :  { %919 = vmatmul.bf16.vlgmr.msrb.gmra.mxu1 %v343_v6 }
 0x1b8   :  { %932 = vmatmul.bf16.vlgmr.msrb.gmra.mxu2 %v344_v7 }
 0x1b9   :  { %945 = vmatmul.bf16.vlgmr.msrb.gmra.mxu3 %v345_v8 }
 0x1ba   :  { %958 = vmatmul.bf16.vlgmr.msra.gmra.mxu0 %v346_v9 }
 0x224   :  { %v868_v11 = vpop.f32.mrf.mxu1 }
 0x227   :  { %v907_v13 = vpop.f32.mrf.mxu0  ;;  %v337_v26 = vpop.xlane.xlu0 %336 }
 0x228   :  { %1594 = vrcp.f32 %v337_v26 }
 0x22b   :  { %v881_v16 = vpop.f32.mrf.mxu2 }
 0x22c   :  { %v894_v17 = vpop.f32.mrf.mxu3  ;;  %v870_v18 = vpop.f32.mrf.mxu1  ;;  %v882_v20 = vadd.f32 %v881_v16, %v868_v11 }
 0x22e   :  { %v895_v22 = vadd.f32 %v894_v17, %v882_v20  ;;  %v1595_v38 = vpop.eup %1594 }
 0x22f   :  { %v909_v19 = vpop.f32.mrf.mxu0 }
 0x230   :  { %v908_v27 = vadd.f32 %v907_v13, %v895_v22 }
 0x233   :  { %v883_v21 = vpop.f32.mrf.mxu2 }
 0x234   :  { %v896_v23 = vpop.f32.mrf.mxu3  ;;  %v920_v24 = vpop.f32.mrf.mxu1 }
 0x235   :  { %v921_v28 = vadd.f32 %v920_v24, %v908_v27 }
 0x237   :  { %v959_v25 = vpop.f32.mrf.mxu0 }
 0x23b   :  { %v933_v29 = vpop.f32.mrf.mxu2 }
 0x23c   :  { %v934_v30 = vadd.f32 %v933_v29, %v921_v28  ;;  %v946_v31 = vpop.f32.mrf.mxu3  ;;  %v922_v32 = vpop.f32.mrf.mxu1 }
 0x23e   :  { %v947_v33 = vadd.f32 %v946_v31, %v934_v30 }
 0x23f   :  { %v961_v34 = vpop.f32.mrf.mxu0 }
 0x240   :  { %v960_v37 = vadd.f32 %v959_v25, %v947_v33 }
 0x242   :  { %v963_v39 = vmul.f32 %v1595_v38, %v960_v37 }
 0x243   :  { %v935_v43 = vpop.f32.mrf.mxu2 }
 0x244   :  { %v964_v44 = vadd.f32 %v963_v39, %v1758_v53  ;;  %v948_v45 = vpop.f32.mrf.mxu3 }
 0x246   :  { %v965_v49 = vpack.c.bf16 %v964_v44, %v964_v44 }
 0x248   :  { %1455 = vmatmul.msk.bf16.vlgmr.msra.gmra.mxu1 %vm188_vm1, %v965_v49 }
 0x2c5   :  { %v993_v40 = vpop.f32.mrf.mxu1 }
 0x2c6   :  { %v994_v52 = vadd.f32 %v1574_v51, %v993_v40 }
 0x2c8   :  { %v997_v41 = vmax.f32 %v994_v52, 0.0 }
 0x2ca   :  { %v998_v47 = vpack.c.bf16 %v997_v41, %v997_v41 }
 0x2cc   :  { %1464 = vmatmul.msk.bf16.vlgmr.msra.gmra.mxu2 %vm188_vm1, %v998_v47 }
 0x2cd   :  { %v995_v53 = vpop.f32.mrf.mxu1 }
 0x34f   :  { %v1026_v57 = vpop.f32.mrf.mxu2 }
 0x350   :  { %v1027_v58 = vadd.f32 %v1575_v56, %v1026_v57 }
 0x352   :  { %v1030_v35 = vmax.f32 %v1027_v58, 0.0 }
 0x354   :  { %v1031_v59 = vadd.f32 %v1030_v35, %v997_v41 }
 0x356   :  { %v1032_v60 = vpack.c.bf16 %v1031_v59, %v1031_v59 }
 0x357   :  { %v1028_v42 = vpop.f32.mrf.mxu2 }
 0x358   :  { %1473 = vmatmul.msk.bf16.vlgmr.msra.gmra.mxu3 %vm188_vm1, %v1032_v60 }
 0x3db   :  { %v1060_v48 = vpop.f32.mrf.mxu3 }
 0x3dc   :  { %v1061_v36 = vadd.f32 %v1576_v61, %v1060_v48 }
 0x3de   :  { %v1064_v62 = vmax.f32 %v1061_v36, 0.0 }
 0x3e0   :  { %v1065_v63 = vpack.c.bf16 %v1064_v62, %v1064_v62 }
 0x3e2   :  { %1482 = vmatmul.msk.bf16.vlgmr.msrb.gmra.mxu0 %vm188_vm1, %v1065_v63 }
 0x3e3   :  { %v1062_v0 = vpop.f32.mrf.mxu3 }
 0x45f   :  { %v1093_v2 = vpop.f32.mrf.mxu0 }
 0x460   :  { %v1094_v3 = vadd.f32 %v1577_v1, %v1093_v2 }
 0x462   :  { %1097 = vst [vmem:[#allocation2] sm:$0xff] %v1094_v3 }
 0x463   :  { %1108 = dma.vmem_to_hbm [thread:$0]  %s1104_s27, 128, %s1106_s29, [#allocation3]  }
 0x467   :  { %v1095_v4 = vpop.f32.mrf.mxu0 }
 0x468   :  { %1620 = dma.done.wait [#allocation3], 128  }
 0x469   :  { %1621 = vsyncadd [#allocation3], 4294967168 }
 0x46a   :  { %1113 = vsyncpa [#allocation3], 1 }

</bundles_post_ra>
